<compile_context>
chip_gen: v5e
topology: v5e:2x2
jax: 0.10.0
libtpu: 0.0.40
codegen_flags: <defaults>
</compile_context>

<pallas_src>
import functools

import jax
import jax.numpy as jnp
from jax import lax
from jax.experimental import pallas as pl
from jax.experimental.pallas import tpu as pltpu


def _pick_tile(dim, target):
    """Use `target` if it tiles `dim` exactly, otherwise fall back to full dim."""
    if dim >= target and dim % target == 0:
        return target
    return dim


# ----------------------------------------------------------------------------
# Shared tiled matmul + bias kernel: f32 accumulator, reduction on grid axis
# `k_axis`, bias added and result cast at the last reduction step.
# ----------------------------------------------------------------------------
def matmul_bias_kernel(x_ref, w_ref, b_ref, o_ref, acc_ref, *, k_axis):
    kb = pl.program_id(k_axis)

    @pl.when(kb == 0)
    def _init():
        acc_ref[...] = jnp.zeros_like(acc_ref)

    acc_ref[...] += jnp.dot(x_ref[...], w_ref[...],
                            preferred_element_type=jnp.float32)

    @pl.when(kb == pl.num_programs(k_axis) - 1)
    def _finalize():
        o_ref[...] = (acc_ref[...] + b_ref[...].astype(jnp.float32)
                      ).astype(o_ref.dtype)


# ----------------------------------------------------------------------------
# 1) Fused, head-group-packed QKV projection:
#    x2d (B*T, Din) -> qkv (3, B, G, T, Dg),  Dg = heads_per_block * head_dim
# ----------------------------------------------------------------------------
def qkv_projection(x2d, w_qkv, b_qkv, B, T, *, tk_target=512):
    _, din = x2d.shape
    _, G, _, Dg = w_qkv.shape
    tk = _pick_tile(din, tk_target)
    grid = (B, 3, G, din // tk)            # reduction (Din) axis last

    kern = functools.partial(matmul_bias_kernel, k_axis=3)
    return pl.pallas_call(
        kern,
        grid=grid,
        in_specs=[
            # x rows of batch b, K-chunk kb (re-used across the (w, g) sweep)
            pl.BlockSpec((T, tk), lambda b, w, g, kb: (b, kb)),
            # per-(tensor, head-group) weight slab (tk, Dg)  — lane-dense N
            pl.BlockSpec((pl.Squeezed(), pl.Squeezed(), tk, Dg),
                         lambda b, w, g, kb: (w, g, kb, 0)),
            # per-(tensor, head-group) bias (1, Dg)
            pl.BlockSpec((pl.Squeezed(), pl.Squeezed(), 1, Dg),
                         lambda b, w, g, kb: (w, g, 0, 0)),
        ],
        out_specs=pl.BlockSpec(
            (pl.Squeezed(), pl.Squeezed(), pl.Squeezed(), T, Dg),
            lambda b, w, g, kb: (w, b, g, 0, 0)),
        out_shape=jax.ShapeDtypeStruct((3, B, G, T, Dg), x2d.dtype),
        scratch_shapes=[pltpu.VMEM((T, Dg), jnp.float32)],
        compiler_params=pltpu.CompilerParams(
            dimension_semantics=("parallel", "parallel", "parallel",
                                 "arbitrary")),
    )(x2d, w_qkv, b_qkv)


# ----------------------------------------------------------------------------
# 2) Fused attention + output projection.
#    Grid (B, G, KV): per (batch, head-group), flash-style sweep over KV blocks
#    with online softmax; at the last KV block the per-head wv is projected
#    through Wout[g] and accumulated into a lane-dense (T, D) output tile
#    (head-group axis G is the out-projection reduction axis).
# ----------------------------------------------------------------------------
def attn_out_kernel(q_ref, k_ref, v_ref, wo_ref, bo_ref, out_ref, qk_ref,
                    m_sc, l_sc, wv_sc, out_sc, *, hpb, hd):
    g = pl.program_id(1)
    kv = pl.program_id(2)
    ng = pl.num_programs(1)
    nkv = pl.num_programs(2)

    @pl.when(kv == 0)
    def _init_softmax():
        m_sc[...] = jnp.full_like(m_sc, -jnp.inf)
        l_sc[...] = jnp.zeros_like(l_sc)
        wv_sc[...] = jnp.zeros_like(wv_sc)

    @pl.when(jnp.logical_and(g == 0, kv == 0))
    def _init_out():
        out_sc[...] = jnp.zeros_like(out_sc)

    # Per-head online softmax over this KV block (static unroll, hpb small).
    for h in range(hpb):
        qh = q_ref[:, h * hd:(h + 1) * hd]          # (T,  hd)  scale pre-folded
        kh = k_ref[:, h * hd:(h + 1) * hd]          # (tkv, hd)
        vh = v_ref[:, h * hd:(h + 1) * hd]          # (tkv, hd)
        # q @ k^T without materializing k.T: contract last dims of both.
        s = lax.dot_general(qh, kh, (((1,), (1,)), ((), ())),
                            preferred_element_type=jnp.float32)   # (T, tkv)
        qk_ref[h, :, :] = s                          # module returns f32 scores

        m_prev = m_sc[h]                             # (T, 1)
        m_new = jnp.maximum(m_prev, jnp.max(s, axis=-1, keepdims=True))
        alpha = jnp.exp(m_prev - m_new)
        p = jnp.exp(s - m_new)
        l_sc[h] = alpha * l_sc[h] + jnp.sum(p, axis=-1, keepdims=True)
        wv_sc[h] = alpha * wv_sc[h] + jnp.dot(p.astype(vh.dtype), vh,
                                              preferred_element_type=jnp.float32)
        m_sc[h] = m_new

    # Last KV block: normalize and fold the per-head out-projection in,
    # accumulating into the lane-dense (T, D) output tile.
    @pl.when(kv == nkv - 1)
    def _project():
        for h in range(hpb):
            inv = pl.reciprocal(l_sc[h], approx=True)    # EUP slot
            wv_h = wv_sc[h] * inv                        # (T, hd)
            out_sc[...] += jnp.dot(wv_h.astype(wo_ref.dtype), wo_ref[h],
                                   preferred_element_type=jnp.float32)

    @pl.when(jnp.logical_and(g == ng - 1, kv == nkv - 1))
    def _finalize():
        out_ref[...] = (out_sc[...] + bo_ref[...].astype(jnp.float32)
                        ).astype(out_ref.dtype)


def attention_out(qkv, w_out, b_out, *, hd, tkv_target=512):
    """qkv: (3, B, G, T, Dg). Returns out (B,T,D) and qk (B,H,T,T) f32."""
    _, B, G, T, Dg = qkv.shape
    hpb = Dg // hd
    D = w_out.shape[-1]
    tkv = _pick_tile(T, tkv_target)
    nkv = T // tkv

    def qkv_spec(which, kv_blocked):
        if kv_blocked:
            return pl.BlockSpec(
                (pl.Squeezed(), pl.Squeezed(), pl.Squeezed(), tkv, Dg),
                lambda b, g, kv, w=which: (w, b, g, kv, 0))
        return pl.BlockSpec(
            (pl.Squeezed(), pl.Squeezed(), pl.Squeezed(), T, Dg),
            lambda b, g, kv, w=which: (w, b, g, 0, 0))

    kern = functools.partial(attn_out_kernel, hpb=hpb, hd=hd)
    out, qk = pl.pallas_call(
        kern,
        grid=(B, G, nkv),
        in_specs=[
            qkv_spec(0, False),              # q: resident across the KV sweep
            qkv_spec(1, True),               # k: per-KV-block
            qkv_spec(2, True),               # v: per-KV-block
            # out-projection weights for head-group g: (hpb, hd, D)
            pl.BlockSpec((pl.Squeezed(), hpb, hd, D),
                         lambda b, g, kv: (g, 0, 0, 0)),
            pl.BlockSpec((1, D), lambda b, g, kv: (0, 0)),
        ],
        out_specs=[
            # lane-dense (T, D) output tile, accumulated across the G axis
            pl.BlockSpec((pl.Squeezed(), T, D), lambda b, g, kv: (b, 0, 0)),
            # raw scores, written per KV block (lane-dense when tkv>=128)
            pl.BlockSpec((pl.Squeezed(), pl.Squeezed(), hpb, T, tkv),
                         lambda b, g, kv: (b, g, 0, 0, kv)),
        ],
        out_shape=(jax.ShapeDtypeStruct((B, T, D), qkv.dtype),
                   jax.ShapeDtypeStruct((B, G, hpb, T, T), jnp.float32)),
        scratch_shapes=[
            pltpu.VMEM((hpb, T, 1), jnp.float32),    # m (running max)
            pltpu.VMEM((hpb, T, 1), jnp.float32),    # l (running denom)
            pltpu.VMEM((hpb, T, hd), jnp.float32),   # unnormalized wv
            pltpu.VMEM((T, D), jnp.float32),         # out-projection accumulator
        ],
        compiler_params=pltpu.CompilerParams(
            dimension_semantics=("parallel", "arbitrary", "arbitrary")),
    )(qkv, qkv, qkv, w_out, b_out)
    return out, qk.reshape(B, G * hpb, T, T)


# ----------------------------------------------------------------------------
# One-time weight preparation (outside the hot path):
#   * hd^-0.5 softmax scale folded into q weights/bias,
#   * weights packed per (tensor, head-group) with Dg >= 256 lanes when possible,
#   * key projection's missing bias becomes zeros,
#   * out-projection weights packed per (group, head) as (G, hpb, hd, D).
# ----------------------------------------------------------------------------
def prepare_params(params, n_head):
    D = params["wq"].shape[0]
    hd = D // n_head
    hpb = min(n_head, max(1, 256 // hd))     # target >=256-lane projection tiles
    while n_head % hpb:
        hpb -= 1
    G = n_head // hpb
    Dg = hpb * hd

    scale = float(hd) ** (-0.5)              # == (hd^-0.25 on q) * (hd^-0.25 on k)
    wq_t = params["wq"].T * scale            # scale folded into the q projection
    bq = params["bq"] * scale
    wk_t = params["wk"].T
    wv_t = params["wv"].T

    w_qkv = jnp.stack([wq_t, wk_t, wv_t], axis=0)                   # (3, Din, D)
    w_qkv = w_qkv.reshape(3, D, G, Dg).transpose(0, 2, 1, 3)        # (3, G, Din, Dg)

    bk = jnp.zeros((D,), bq.dtype)
    b_qkv = jnp.stack([bq, bk, params["bv"]], axis=0).reshape(3, G, 1, Dg)

    w_out = params["wo"].T.reshape(G, hpb, hd, D)                   # (G, hpb, hd, D)
    b_out = params["bo"].reshape(1, D)

    return {"w_qkv": w_qkv, "b_qkv": b_qkv, "w_out": w_out, "b_out": b_out}


# ----------------------------------------------------------------------------
# MultiHeadAttention forward (self-attention, no mask, no kv_cache)
# ----------------------------------------------------------------------------
def multi_head_attention(x, kparams, n_head):
    B, T, D = x.shape
    hd = D // n_head
    x2d = x.reshape(B * T, D)
    qkv = qkv_projection(x2d, kparams["w_qkv"], kparams["b_qkv"], B, T)
    out, qk = attention_out(qkv, kparams["w_out"], kparams["b_out"], hd=hd)
    return out, qk


# ----------------------------------------------------------------------------
# Pure-JAX reference (matches the PyTorch module)
# ----------------------------------------------------------------------------
def reference(x, params, n_head):
    B, T, D = x.shape
    hd = D // n_head
    scale = float(hd) ** (-0.25)
    q = x @ params["wq"].T + params["bq"]
    k = x @ params["wk"].T
    v = x @ params["wv"].T + params["bv"]
    qh = q.reshape(B, T, n_head, hd).transpose(0, 2, 1, 3) * scale
    kh = k.reshape(B, T, n_head, hd).transpose(0, 2, 3, 1) * scale
    vh = v.reshape(B, T, n_head, hd).transpose(0, 2, 1, 3)
    qk = (qh @ kh).astype(jnp.float32)
    w = jax.nn.softmax(qk, axis=-1).astype(q.dtype)
    wv = (w @ vh).transpose(0, 2, 1, 3).reshape(B, T, D)
    out = wv @ params["wo"].T + params["bo"]
    return out, qk


if __name__ == "__main__":
    # Small shapes consistent with the module: batch=2, seq=8, n_state=32, heads=4
    B, T, D, H = 2, 8, 32, 4
    key = jax.random.PRNGKey(0)
    ks = jax.random.split(key, 8)

    params = {
        "wq": jax.random.normal(ks[0], (D, D), jnp.float32) * 0.05,
        "bq": jax.random.normal(ks[1], (D,), jnp.float32) * 0.05,
        "wk": jax.random.normal(ks[2], (D, D), jnp.float32) * 0.05,
        "wv": jax.random.normal(ks[3], (D, D), jnp.float32) * 0.05,
        "bv": jax.random.normal(ks[4], (D,), jnp.float32) * 0.05,
        "wo": jax.random.normal(ks[5], (D, D), jnp.float32) * 0.05,
        "bo": jax.random.normal(ks[6], (D,), jnp.float32) * 0.05,
    }
    x = jax.random.normal(ks[7], (B, T, D), jnp.float32)

    kparams = prepare_params(params, H)
    out, qk = multi_head_attention(x, kparams, H)
    out = jax.block_until_ready(out)
    qk = jax.block_until_ready(qk)

    out_ref, qk_ref = reference(x, params, H)
    assert out.shape == (B, T, D) and qk.shape == (B, H, T, T)
    # out tolerance loosened for the approx (EUP) reciprocal in softmax;
    # qk tolerance slightly loosened for the folded hd^-0.5 scale.
    assert jnp.allclose(out, out_ref, atol=2e-3, rtol=2e-3), "output mismatch"
    assert jnp.allclose(qk, qk_ref, atol=2e-4, rtol=2e-4), "qk mismatch"

    print("KERNEL_OK")
</pallas_src>

<mosaic_0001>
module attributes {stable_mosaic.version = 11 : i64} {
  func.func @matmul_bias_kernel(%arg0: i32, %arg1: i32, %arg2: i32, %arg3: i32, %arg4: memref<8x32xf32, #tpu.memory_space<vmem>>, %arg5: memref<1x1x32x32xf32, #tpu.memory_space<vmem>>, %arg6: memref<1x1x1x32xf32, #tpu.memory_space<vmem>>, %arg7: memref<1x1x1x8x32xf32, #tpu.memory_space<vmem>>, %arg8: memref<8x32xf32, #tpu.memory_space<vmem>>) attributes {dimension_semantics = [#tpu.dimension_semantics<parallel>, #tpu.dimension_semantics<parallel>, #tpu.dimension_semantics<parallel>, #tpu.dimension_semantics<arbitrary>], iteration_bounds = array<i64: 2, 3, 1, 1>, scalar_prefetch = 0 : i64, scratch_operands = 1 : i64, tpu.core_type = #tpu.core_type<tc>, window_params = [{transform_indices = @transform_0, window_bounds = array<i64: 8, 32>}, {transform_indices = @transform_1, window_bounds = array<i64: 1, 1, 32, 32>}, {transform_indices = @transform_2, window_bounds = array<i64: 1, 1, 1, 32>}, {transform_indices = @transform_3, window_bounds = array<i64: 1, 1, 1, 8, 32>}]} {
    %c0_i32 = arith.constant 0 : i32
    %0 = arith.cmpi eq, %arg3, %c0_i32 : i32
    %1 = arith.extui %0 : i1 to i32
    %c0_i32_0 = arith.constant 0 : i32
    %2 = arith.cmpi ne, %1, %c0_i32_0 : i32
    scf.if %2 {
      %cst_12 = arith.constant 0.000000e+00 : f32
      %13 = vector.broadcast %cst_12 : f32 to vector<8x32xf32>
      %c0_13 = arith.constant 0 : index
      %c0_14 = arith.constant 0 : index
      %14 = vector.load %arg8[%c0_13, %c0_14] : memref<8x32xf32, #tpu.memory_space<vmem>>, vector<8x32xf32>
      tpu.vector_store %arg8[%c0_13, %c0_14], %13 {strides = array<i32>} : memref<8x32xf32, #tpu.memory_space<vmem>>, vector<8x32xf32>,
    } else {
    }
    %c0 = arith.constant 0 : index
    %c0_1 = arith.constant 0 : index
    %3 = vector.load %arg8[%c0, %c0_1] : memref<8x32xf32, #tpu.memory_space<vmem>>, vector<8x32xf32>
    %c0_2 = arith.constant 0 : index
    %c0_3 = arith.constant 0 : index
    %4 = vector.load %arg4[%c0_2, %c0_3] : memref<8x32xf32, #tpu.memory_space<vmem>>, vector<8x32xf32>
    %c0_4 = arith.constant 0 : index
    %c0_5 = arith.constant 0 : index
    %c0_6 = arith.constant 0 : index
    %c0_7 = arith.constant 0 : index
    %5 = vector.load %arg5[%c0_4, %c0_5, %c0_6, %c0_7] : memref<1x1x32x32xf32, #tpu.memory_space<vmem>>, vector<1x1x32x32xf32>
    %6 = vector.shape_cast %5 : vector<1x1x32x32xf32> to vector<32x32xf32>
    %cst = arith.constant dense<0.000000e+00> : vector<8x32xf32>
    %7 = tpu.matmul %4, %6, %cst {dimension_numbers = #tpu.dot_dimension_numbers<[1], [0], [0], [1], [0, 0, 1, 1], [], []>} : vector<8x32xf32>, vector<32x32xf32>, vector<8x32xf32> -> vector<8x32xf32>
    %8 = arith.addf %3, %7 : vector<8x32xf32>
    %c0_8 = arith.constant 0 : index
    %c0_9 = arith.constant 0 : index
    %9 = vector.load %arg8[%c0_8, %c0_9] : memref<8x32xf32, #tpu.memory_space<vmem>>, vector<8x32xf32>
    tpu.vector_store %arg8[%c0_8, %c0_9], %8 {strides = array<i32>} : memref<8x32xf32, #tpu.memory_space<vmem>>, vector<8x32xf32>,
    %c0_i32_10 = arith.constant 0 : i32
    %10 = arith.cmpi eq, %arg3, %c0_i32_10 : i32
    %11 = arith.extui %10 : i1 to i32
    %c0_i32_11 = arith.constant 0 : i32
    %12 = arith.cmpi ne, %11, %c0_i32_11 : i32
    scf.if %12 {
      %c0_12 = arith.constant 0 : index
      %c0_13 = arith.constant 0 : index
      %13 = vector.load %arg8[%c0_12, %c0_13] : memref<8x32xf32, #tpu.memory_space<vmem>>, vector<8x32xf32>
      %c0_14 = arith.constant 0 : index
      %c0_15 = arith.constant 0 : index
      %c0_16 = arith.constant 0 : index
      %c0_17 = arith.constant 0 : index
      %14 = vector.load %arg6[%c0_14, %c0_15, %c0_16, %c0_17] : memref<1x1x1x32xf32, #tpu.memory_space<vmem>>, vector<1x1x1x32xf32>
      %15 = vector.shape_cast %14 : vector<1x1x1x32xf32> to vector<1x32xf32>
      %16 = vector.broadcast %15 : vector<1x32xf32> to vector<8x32xf32>
      %17 = arith.addf %13, %16 : vector<8x32xf32>
      %c0_18 = arith.constant 0 : index
      %c0_19 = arith.constant 0 : index
      %c0_20 = arith.constant 0 : index
      %c0_21 = arith.constant 0 : index
      %c0_22 = arith.constant 0 : index
      %18 = vector.load %arg7[%c0_18, %c0_19, %c0_20, %c0_21, %c0_22] : memref<1x1x1x8x32xf32, #tpu.memory_space<vmem>>, vector<1x1x1x8x32xf32>
      %19 = vector.shape_cast %18 : vector<1x1x1x8x32xf32> to vector<8x32xf32>
      %20 = vector.shape_cast %17 : vector<8x32xf32> to vector<1x1x1x8x32xf32>
      tpu.vector_store %arg7[%c0_18, %c0_19, %c0_20, %c0_21, %c0_22], %20 {strides = array<i32>} : memref<1x1x1x8x32xf32, #tpu.memory_space<vmem>>, vector<1x1x1x8x32xf32>,
    } else {
    }
    return
  }
  func.func @transform_0(%arg0: i32, %arg1: i32, %arg2: i32, %arg3: i32) -> (i32, i32) {
    %c0_i32 = arith.constant 0 : i32
    return %arg0, %arg3 : i32, i32
  }
  func.func @transform_1(%arg0: i32, %arg1: i32, %arg2: i32, %arg3: i32) -> (i32, i32, i32, i32) {
    %c0_i32 = arith.constant 0 : i32
    %c0_i32_0 = arith.constant 0 : i32
    return %arg1, %arg2, %arg3, %c0_i32 : i32, i32, i32, i32
  }
  func.func @transform_2(%arg0: i32, %arg1: i32, %arg2: i32, %arg3: i32) -> (i32, i32, i32, i32) {
    %c0_i32 = arith.constant 0 : i32
    %c0_i32_0 = arith.constant 0 : i32
    %c0_i32_1 = arith.constant 0 : i32
    return %arg1, %arg2, %c0_i32, %c0_i32_0 : i32, i32, i32, i32
  }
  func.func @transform_3(%arg0: i32, %arg1: i32, %arg2: i32, %arg3: i32) -> (i32, i32, i32, i32, i32) {
    %c0_i32 = arith.constant 0 : i32
    %c0_i32_0 = arith.constant 0 : i32
    %c0_i32_1 = arith.constant 0 : i32
    return %arg1, %arg0, %arg2, %c0_i32, %c0_i32_0 : i32, i32, i32, i32, i32
  }
}

</mosaic_0001>

<bundles_post_ra>
// kernel: tpu_custom_call.1
= control target key start
LH: loop header
LB: loop body
LE: loop exit
PB: predicated region body
PF: predicated region fallthrough
CT: control target
= control target key end

     0   :  { %s1205_s0 = inlined_call_operand.hbm [shape: f32[16,32], index: 0, kind: input, shape index: {}]   ;;  %s1206_s1 = inlined_call_operand.hbm [shape: f32[3,1,32,32], index: 1, kind: input, shape index: {}]   ;;  %s1207_s2 = inlined_call_operand.hbm [shape: f32[3,1,1,32], index: 2, kind: input, shape index: {}]   ;;  %s1208_s3 = inlined_call_operand.hbm [shape: f32[3,2,1,8,32], index: 3, kind: output, shape index: {}]  }
   0x1   :  { %1220 = sst [smem:[#allocation25_spill]] %s1206_s1 }
   0x2   :  { %1221 = sst [smem:[#allocation26_spill]] %s1208_s3 }
   0x3   :  { %8 = vsyncpa [#allocation4], 0 }
   0x4   :  { %10 = vsyncpa [#allocation4 + $0x1], 0 }
   0x5   :  { %11 = vsyncpa [#allocation7], 0 }
   0x6   :  { %13 = vsyncpa [#allocation7 + $0x1], 0 }
   0x7   :  { %14 = vsyncpa [#allocation5], 0 }
   0x8   :  { %16 = vsyncpa [#allocation5 + $0x1], 0  ;;  %s935_s12 = smov 0   ;;  %s937_s13 = smov 0  }
   0x9   :  { %s939_s14 = smov 0   ;;  %s941_s15 = smov 0  }
   0xa   :  { %s943_s16 = smov 0   ;;  %s945_s17 = smov 0  }
   0xb   :  { %s947_s18 = smov 0   ;;  %s949_s19 = smov 0  }
   0xc   :  { %s951_s20 = smov 0   ;;  %s953_s21 = smov 0  }
   0xd   :  { %s955_s22 = smov 0   ;;  %s957_s23 = smov 0  }
   0xe   :  { %s959_s24 = smov 0   ;;  %s961_s25 = smov 0  }
   0xf LB: > { %1222 = sst [smem:[#allocation13_spill]] %s858_s12  ;;  %p65_p0 = scmp.eq.s32.totalorder %s910_s25, 0  ;;  %s910_s25 = sphi %s961_s25, %s22_s25   ;;  %s906_s24 = sphi %s959_s24, %s1257_s24   ;;  %s902_s23 = sphi %s957_s23, %s1267_s23   ;;  %s898_s22 = sphi %s955_s22, %s1255_s22   ;;  %s894_s21 = sphi %s953_s21, %s1266_s21   ;;  %s890_s20 = sphi %s951_s20, %s1254_s20   ;;  %s886_s19 = sphi %s949_s19, %s1265_s19   ;;  %s882_s18 = sphi %s947_s18, %s1264_s18   ;;  %s878_s17 = sphi %s945_s17, %s1263_s17   ;;  %s874_s16 = sphi %s943_s16, %s1262_s16   ;;  %s870_s15 = sphi %s941_s15, %s1261_s15   ;;  %s866_s14 = sphi %s939_s14, %s1251_s14   ;;  %s862_s13 = sphi %s937_s13, %s1260_s13   ;;  %s858_s12 = sphi %s935_s12, %s1259_s12  }
  0x10   : > { %1223 = sst [smem:[#allocation14_spill]] %s866_s14  ;;  %p94_p1 = scmp.ne.s32.totalorder %s878_s17, %s874_s16 }
  0x11   : > { %1224 = sst [smem:[#allocation15_spill]] %s890_s20  ;;  %p100_p2 = scmp.ne.s32.totalorder %s874_s16, %s870_s15 }
  0x12   : > { %1225 = sst [smem:[#allocation16_spill]] %s898_s22  ;;  %p552_p3 = scmp.lt.s32.totalorder %s910_s25, 6 }
  0x13   : > { %1226 = sst [smem:[#allocation17_spill]] %s906_s24  ;;  %p96_p4 = por %p94_p1, %p65_p0 }
  0x14   : > { %s202_s27 = sand.u32 1, %s910_s25   ;;  %s1209_s28 = sand.u32 1, %s878_s17  }
  0x15   : > { %s516_s29 = sshll.u32 %s1209_s28, 5  ;;  %s529_s30 = sshll.u32 %s902_s23, 5 }
  0x16   : > { %s1227_s1 = sld [smem:[#allocation25_spill]]  ;;  %s206_s8 = scalar_lea.vmem [#allocation6], %s516_s29 }
  0x17   : > { %s218_s9 = sshll.u32 %s206_s8, 4  ;;  %p1024_p5 = pnand %p552_p3, %p96_p4  ;;  %s219_s9 = int_to_ptr.vmem [resolvable:$true] %s218_s9 }
  0x18   : > { %p519_p6 = scmp.ge.s32.totalorder %s910_s25, 1  ;;  %p244_p7 = scmp.lt.s32.totalorder %s910_s25, 7 }
  0x19   : > { %s1030_s11 = scalar_lea.sflag [#allocation7], %s202_s27  ;;  %s912_s29 = smov 128  }
  0x1a   : > { %p1035_p8 = pnand %p519_p6, %p244_p7  ;;  %s1040_s5 = sadd.s32 4294967295, %s910_s25  }
  0x1b   : > { %s44_s8 = sadd.s32 1, %s902_s23  ;;  %s48_s27 = sadd.s32 1, %s906_s24 }
  0x1c   : > { %s215_s6 = scalar_lea.hbm %s1227_s1, %s529_s30  ;;  %s913_s30 = smov 8  }
  0x1d   : > { %s216_s7 = sshll.u32 %s215_s6, 4  ;;  %s511_s6 = sadd.s32 4294967294, %s910_s25   ;;  %s217_s7 = int_to_ptr.hbm [resolvable:$true] %s216_s7 }
  0x1e   : > { %544 = dma.hbm_to_vmem [thread:$0]  (!%p1024_p5), %s217_s7, 512, %s219_s9, %s1030_s11, %s912_s29, %s912_s29, %s913_s30  }
  0x1f   : > { %p46_p9 = scmp.ge.s32.totalorder %s44_s8, 3  ;;  %s57_s28 = sadd.s32 1, %s890_s20 }
  0x20   : > { %p64_p10 = scmp.ne.s32.totalorder %s890_s20, %s886_s19  ;;  %p70_p12 = scmp.ne.s32.totalorder %s886_s19, %s882_s18 }
  0x21   : > { %s1269_s8 = smov (%p46_p9, %s44_s8), 0  ;;  %s1271_s27 = smov (!%p46_p9, %s48_s27), %s906_s24 }
  0x22   : > { %1230 = sst [smem:[#allocation18_spill]] %s1269_s8  ;;  %p1053_p11 = por %p65_p0, %p64_p10 }
  0x23   : > { %p50_p13 = scmp.ge.s32.totalorder %s1271_s27, 2  ;;  %p71_p1 = scmp.eq.s32.totalorder %s1040_s5, 0 }
  0x24   : > { %s80_s9 = ssub.s32 %s902_s23, %s1269_s8  ;;  %s145_s29 = sadd.s32 1, %s866_s14 }
  0x25   : > { %s1273_s27 = smov (%p50_p13, %s1271_s27), 0  ;;  %p1065_p4 = por %p71_p1, %p70_p12 }
  0x26   : > { %1232 = sst [smem:[#allocation19_spill]] %s1273_s27  ;;  %p85_p0 = scmp.eq.s32.totalorder %s80_s9, 0 }
  0x27   : > { %s52_s26 = ssub.s32 %s906_s24, %s1273_s27  ;;  %p1074_p6 = por %p100_p2, %p71_p1 }
  0x28   : > { %p55_p7 = scmp.eq.s32.totalorder %s52_s26, 0  ;;  %s140_s1 = sor.u32 %s80_s9, %s52_s26 }
  0x29   : > { %s1235_s8 = sadd.s32 1, %s878_s17  ;;  %p143_p9 = scmp.eq.s32.totalorder %s140_s1, 0 }
  0x2a   : > { %s1081_s3 = scalar_select %p85_p0, %s878_s17, %s1235_s8  }
  0x2b   : > { %s1084_s22 = scalar_select %p55_p7, %s890_s20, %s57_s28  }
  0x2c   : > { %1236 = sst [smem:[#allocation20_spill]] %s1081_s3  ;;  %p155_p10 = scmp.ne.s32.totalorder %s866_s14, %s862_s13 }
  0x2d   : > { %1237 = sst [smem:[#allocation21_spill]] %s1084_s22  ;;  %p156_p12 = scmp.eq.s32.totalorder %s1040_s5, 5 }
  0x2e   : > { %p161_p13 = scmp.ne.s32.totalorder %s862_s13, %s858_s12  ;;  %p162_p1 = scmp.eq.s32.totalorder %s511_s6, 5 }
  0x2f   : > { %s1092_s27 = scalar_select %p143_p9, %s866_s14, %s145_s29  }
  0x30   : > { %p1094_p2 = por %p156_p12, %p155_p10  ;;  %s182_s26 = sand.u32 1, %s890_s20  }
  0x31   : > { %1238 = sst [smem:[#allocation22_spill]] %s1092_s27  ;;  %s515_s8 = sshll.u32 %s906_s24, 3 }
  0x32   : > { %s1239_s15 = scalar_select %p1094_p2, 1, 0 }
  0x33   : > { %p1100_p0 = por %p162_p1, %p161_p13  ;;  %s514_s1 = sshll.u32 %s182_s26, 3 }
  0x34   : > { %1240 = sst [smem:[#allocation23_spill]] %s1239_s15  ;;  %s191_s29 = scalar_lea.hbm %s1205_s0, %s515_s8 }
  0x35   : > { %s1241_s28 = scalar_select %p1100_p0, 1, 0 }
  0x36   : > { %s193_s3 = sshll.u32 %s191_s29, 4  ;;  %s186_s27 = scalar_lea.vmem [#allocation3], %s514_s1  ;;  %s194_s3 = int_to_ptr.hbm [resolvable:$true] %s193_s3 }
  0x37   : > { %1242 = sst [smem:[#allocation24_spill]] %s1241_s28  ;;  %s195_s14 = sshll.u32 %s186_s27, 4  ;;  %s196_s14 = int_to_ptr.vmem [resolvable:$true] %s195_s14 }
  0x38   : > { %p539_p7 = pnand %p552_p3, %p1053_p11  ;;  %s235_s20 = scalar_lea.hbm %s1207_s2, %s902_s23 }
  0x39   : > { %s237_s28 = sshll.u32 %s235_s20, 4  ;;  %s183_s12 = scalar_lea.sflag [#allocation4], %s182_s26  ;;  %s238_s28 = int_to_ptr.hbm [resolvable:$true] %s237_s28 }
  0x3a   : > { %541 = dma.hbm_to_vmem [thread:$0]  (!%p539_p7), %s194_s3, 128, %s196_s14, %s183_s12  }
  0x3b   : > { %s1243_s22 = sand.u32 1, %s878_s17   ;;  %248 = sbr.rel (%p1035_p8) target bundleno = 218 (0xda), region = 32 }
  0x3c   : > { %s231_s9 = scalar_lea.vmem [#allocation8], %s1243_s22  ;;  %s250_s27 = sand.u32 (!%p1035_p8), 1, %s886_s19  }
  0x3d   : > { %s239_s15 = sshll.u32 %s231_s9, 4  ;;  %s520_s7 = sshll.u32 (!%p1035_p8), %s250_s27, 3  ;;  %s240_s15 = int_to_ptr.vmem [resolvable:$true] %s239_s15 }
  0x3e   : > { %547 = dma.hbm_to_vmem [thread:$0]  (!%p1024_p5), %s238_s28, 16, %s240_s15, %s1030_s11  }
  0x3f   : > { %s251_s8 = scalar_lea.sflag (!%p1035_p8), [#allocation4], %s250_s27  ;;  %s254_s24 = scalar_lea.vmem (!%p1035_p8), [#allocation3], %s520_s7 }
  0x40   : > { %845 = dma.done.wait (%p1065_p4), %s251_s8, 128  }
  0x41   : > { %847 = vsyncadd (%p1065_p4), %s251_s8, 4294967168  ;;  %s260_s3 = sand.u32 1, %s1040_s5   ;;  %s262_s12 = sand.u32 1, %s874_s16  }
  0x42   : > { %s521_s14 = sshll.u32 %s262_s12, 5  ;;  %s261_s20 = scalar_lea.sflag [#allocation7], %s260_s3 }
  0x43   : > { %s264_s10 = scalar_lea.vmem [#allocation6], %s521_s14 }
  0x44   : > { %849 = dma.done.wait (%p1074_p6), %s261_s20, 528  }
  0x45   : > { %851 = vsyncadd (%p1074_p6), %s261_s20, 4294966768  ;;  %vm311_vm0 = vcmask 261120   ;;  %v914_v0 = vmov 0.0   ;;  %s1244_s11 = sld [smem:[#allocation16_spill]]  ;;  %v318_v1 = vld [vmem:[%s264_s10 + $0x18] sm:$0xff]  ;;  %v317_v2 = vld [vmem:[%s264_s10 + $0x10] sm:$0xff] }
  0x46   : > { %312 = vst.msk [vmem:[#allocation2] sm:$0xff] %vm311_vm0, %v914_v0  ;;  %335 = vmatpush.msra.mxu0 %v318_v1  ;;  %v316_v3 = vld [vmem:[%s264_s10 + $0x8] sm:$0xff]  ;;  %v315_v4 = vld [vmem:[%s264_s10] sm:$0xff]  ;;  %v314_v5 = vld [vmem:[%s254_s24] sm:$0xff]  ;;  %s273_s4 = scalar_lea.vmem [#allocation8], %s262_s12  ;;  %s525_s5 = sshll.u32 %s894_s21, 1 }
  0x47   : > { %s303_s30 = sand.u32 1, %s862_s13   ;;  %s1245_s29 = sld [smem:[#allocation26_spill]]  ;;  %v669_v9 = vld [vmem:[%s273_s4] ss:$0 sm:$0xff] }
  0x48   : > { %336 = vmatpush.msra.mxu0 %v317_v2  ;;  %s522_s15 = sshll.u32 %s303_s30, 3  ;;  %s356_s21 = scalar_lea.sflag [#allocation5], %s303_s30 }
  0x49   : > { %s305_s9 = scalar_lea.vmem [#allocation9], %s522_s15 }
  0x4a   : > { %337 = vmatpush.msra.mxu0 %v316_v3  ;;  %s371_s27 = sshll.u32 %s305_s9, 4  ;;  %s372_s27 = int_to_ptr.vmem [resolvable:$true] %s371_s27 }
  0x4b   : > { %s367_s18 = sadd.s32 %s1244_s11, %s525_s5 }
  0x4c   : > { %338 = vmatpush.msra.mxu0 %v315_v4  ;;  %s526_s26 = sshll.u32 %s367_s18, 3 }
  0x4d   : > { %523 = vmatmul.msk.f32.vlgmr.msra.gmra.mxu0 %vm311_vm0, %v314_v5  ;;  %v313_v6 = vld [vmem:[#allocation2] sm:$0xff]  ;;  %s369_s22 = scalar_lea.hbm %s1245_s29, %s526_s26  ;;  %s780_s14 = scalar_lea.hbm %s1245_s29, 48 }
  0x4e   : > { %s373_s7 = sshll.u32 %s369_s22, 4  ;;  %s374_s7 = int_to_ptr.hbm [resolvable:$true] %s373_s7 }
  0x4f   : > { %s774_s8 = sshra.s32 %s374_s7, 4  ;;  %s775_s8 = int_to_ptr.hbm [resolvable:$true] %s774_s8 }
  0x50   : > { %s776_s24 = scalar_lea.hbm %s775_s8, 8  ;;  %p781_p11 = scmp.lt.s32.totalorder %s775_s8, %s1245_s29 }
  0x51   : > { %p777_p3 = scmp.ne.s32.totalorder %s775_s8, %s776_s24  ;;  %p782_p4 = scmp.lt.s32.totalorder %s780_s14, %s776_s24 }
  0x53   : > { %p778_p5 = pnand %p777_p3, %p1094_p2  ;;  %p783_p6 = por %p782_p4, %p781_p11 }
  0x55   : > { %p779_p8 = pneg %p778_p5 }
  0x57   : > { %p784_p9 = pnand %p783_p6, %p779_p8 }
  0xca   : > { %v340_v7 = vpop.f32.mrf.mxu0 }
  0xcb   : > { %v343_v8 = vadd.f32 %v340_v7, %v313_v6 }
  0xcd   : > { %344 = vst.msk [vmem:[#allocation2] sm:$0xff] %vm311_vm0, %v343_v8 }
  0xd4   : > { %v348_v10 = vld [vmem:[#allocation2] sm:$0xff] }
  0xd5   : > { %v353_v11 = vadd.f32 %v669_v9, %v348_v10 }
  0xd7   : > { %354 = vst.msk [vmem:[%s305_s9] sm:$0xff] %vm311_vm0, %v353_v11 }
  0xd8   : > { %787 = shalt.err (!%p784_p9)
}
  0xd9   : > { %536 = dma.vmem_to_hbm [thread:$0]  (%p1094_p2), %s372_s27, 128, %s374_s7, %s356_s21  }
  0xda PF: > { %s1247_s11 = sld [smem:[#allocation13_spill]]  ;;  %p553_p10 = scmp.ge.s32.totalorder %s910_s25, 2 }
  0xdc   : > { %p549_p12 = pnand %p553_p10, %p1100_p0 }
  0xde   : > { %p550_p13 = pneg %p549_p12 }
  0xe0   : > { %s385_s5 = sand.u32 1, %s1247_s11  }
  0xe1   : > { %s386_s30 = scalar_lea.sflag [#allocation5], %s385_s5 }
  0xe2   : > { %853 = dma.done.wait (%p550_p13), %s386_s30, 128  }
  0xe3   : > { %855 = vsyncadd (%p550_p13), %s386_s30, 4294967168  ;;  %s22_s25 = sadd.s32 1, %s910_s25   ;;  %s1250_s15 = sld [smem:[#allocation14_spill]] }
  0xe4   : > { %p1158_p1 = scmp.ge.s32.totalorder %s22_s25, 8   ;;  %s1251_s14 = sld [smem:[#allocation22_spill]] }
  0xe5   : > { %s1252_s26 = sld [smem:[#allocation20_spill]]  ;;  %s1259_s12 = smov %s862_s13 }
  0xe6   : > { %s1253_s28 = sld [smem:[#allocation15_spill]]  ;;  %s1264_s18 = smov %s886_s19 }
  0xe7   : > { %s1254_s20 = sld [smem:[#allocation21_spill]]  ;;  %s1266_s21 = smov %s902_s23 }
  0xe8   : > { %s1255_s22 = sld [smem:[#allocation17_spill]] }
  0xe9   : > { %s1256_s1 = sld [smem:[#allocation18_spill]]  ;;  %s1260_s13 = smov %s1250_s15 }
  0xea   : > { %s1257_s24 = sld [smem:[#allocation19_spill]]  ;;  %s1261_s15 = smov %s874_s16 }
  0xeb   : > { %s1262_s16 = smov %s878_s17  ;;  %s1263_s17 = smov %s1252_s26 }
  0xec   : > { %s1265_s19 = smov %s1253_s28  ;;  %21 = sbr.rel (!%p1158_p1) target bundleno = 15 (0xf), region = 109 }
  0xef   : > { %s1267_s23 = smov %s1256_s1 }
  0xf1   :  { %392 = vsyncpa [#allocation4], 1 }
  0xf2   :  { %394 = vsyncpa [#allocation4 + $0x1], 1 }
  0xf3   :  { %395 = vsyncpa [#allocation7], 1 }
  0xf4   :  { %397 = vsyncpa [#allocation7 + $0x1], 1 }
  0xf5   :  { %398 = vsyncpa [#allocation5], 1 }
  0xf6   :  { %400 = vsyncpa [#allocation5 + $0x1], 1 }

</bundles_post_ra>
